<compile_context>
chip_gen: v6e
topology: v6e:2x2x1
jax: 0.10.0
libtpu: 0.0.40
codegen_flags: <defaults>
</compile_context>

<pallas_src>
import functools

import jax
import jax.numpy as jnp
from jax import lax
from jax.experimental import pallas as pl
from jax.experimental.pallas import tpu as pltpu


def _mha_kernel(x_ref, wqkv_ref, wp_ref, bp_ref, o_ref, cat_ref, *,
                batch_block, seq_len, num_heads, head_size, n_embd):
    # x_ref block: (Bb*T, C) flattened slab; wqkv_ref: (C, 3F); wp_ref: (C, C); bp_ref: (1, C).
    T, H, hs, C = seq_len, num_heads, head_size, n_embd
    F = H * hs                          # == C for this module
    scale = C ** (-0.5)                 # PyTorch code scales by n_embd**-0.5 (not head_size**-0.5)

    # Causal additive bias, built once per grid step: 0 where kept, -1e30 where masked (finite).
    row = lax.broadcasted_iota(jnp.int32, (T, T), 0)
    col = lax.broadcasted_iota(jnp.int32, (T, T), 1)
    mask_bias = jnp.where(row >= col, 0.0, -1e30).astype(jnp.float32)

    xs = x_ref[...]                                 # (Bb*T, C)
    wqkv = wqkv_ref[...]                            # (C, 3F)
    wp = wp_ref[...]                                # (C, C)
    bias = bp_ref[...].astype(jnp.float32)          # (1, C), broadcasts over rows

    # ONE dense QKV projection over the whole flattened block.
    qkv = jnp.dot(xs, wqkv, preferred_element_type=jnp.float32)       # (Bb*T, 3F)
    q_all = qkv[:, 0 * F:1 * F] * scale                               # scale folded once
    k_all = qkv[:, 1 * F:2 * F]
    v_all = qkv[:, 2 * F:3 * F]

    # Per-(batch-row, head): scores / softmax / PV only. Results go straight into the
    # VMEM scratch slab (no jnp.concatenate, no long vreg live ranges).
    for b in range(batch_block):                    # static unrolled, small
        r0, r1 = b * T, (b + 1) * T
        for h in range(H):                          # static unrolled over heads
            c0, c1 = h * hs, (h + 1) * hs
            q = q_all[r0:r1, c0:c1]                 # (T, hs)
            k = k_all[r0:r1, c0:c1]
            v = v_all[r0:r1, c0:c1]

            # Scores without an explicit transpose: contract head dims directly.
            s = lax.dot_general(q, k, dimension_numbers=(((1,), (1,)), ((), ())),
                                preferred_element_type=jnp.float32)   # (T, T)
            s = s + mask_bias
            s = s - jnp.max(s, axis=-1, keepdims=True)
            p = jnp.exp(s)
            p = p * pl.reciprocal(jnp.sum(p, axis=-1, keepdims=True), approx=False)

            cat_ref[r0:r1, c0:c1] = jnp.dot(p, v, preferred_element_type=jnp.float32)

    # ONE dense output projection + bias over the whole slab.
    y = jnp.dot(cat_ref[...], wp, preferred_element_type=jnp.float32) + bias
    o_ref[...] = y.astype(o_ref.dtype)


def multi_head_attn(x, wq, wk, wv, wp_t, bp, *, batch_block=1):
    """x: (B, T, C); wq/wk/wv: (H, C, hs); wp_t: (C, C) (= proj.weight.T); bp: (1, C)."""
    B, T, C = x.shape
    H, _, hs = wq.shape
    F = H * hs
    assert B % batch_block == 0, "batch_block must divide B"

    # Pack per-head QKV weights into a single lane-dense (C, 3F) matrix.
    # Columns: [0:F) queries, [F:2F) keys, [2F:3F) values; head h occupies [h*hs,(h+1)*hs)
    # within its group.
    def _flat(w):  # (H, C, hs) -> (C, H*hs)
        return jnp.transpose(w, (1, 0, 2)).reshape(C, F)

    w_qkv = jnp.concatenate([_flat(wq), _flat(wk), _flat(wv)], axis=-1)   # (C, 3F)

    # Present the batch as a flattened (B*T, C) slab so each grid step works on a single
    # (Bb*T, C) matrix (free wrapper-side reshape; contiguous in row-major).
    x2 = x.reshape(B * T, C)
    rows = batch_block * T

    kernel = functools.partial(_mha_kernel, batch_block=batch_block, seq_len=T,
                               num_heads=H, head_size=hs, n_embd=C)
    grid = (B // batch_block,)

    out = pl.pallas_call(
        kernel,
        out_shape=jax.ShapeDtypeStruct((B * T, C), x.dtype),
        grid_spec=pltpu.PrefetchScalarGridSpec(
            num_scalar_prefetch=0,
            grid=grid,
            in_specs=[
                pl.BlockSpec((rows, C), lambda i: (i, 0)),        # flattened x slab
                pl.BlockSpec((C, 3 * F), lambda i: (0, 0)),       # fused QKV weights
                pl.BlockSpec((C, C), lambda i: (0, 0)),           # proj weight (transposed)
                pl.BlockSpec((1, C), lambda i: (0, 0)),           # proj bias
            ],
            out_specs=pl.BlockSpec((rows, C), lambda i: (i, 0)),
            scratch_shapes=[pltpu.VMEM((rows, C), jnp.float32)],  # head-output slab
        ),
        compiler_params=pltpu.CompilerParams(dimension_semantics=("parallel",)),
    )(x2, w_qkv, wp_t, bp)
    return out.reshape(B, T, C)


def _reference(x, wq, wk, wv, wp_t, bp):
    """Pure-JAX reference mirroring the PyTorch forward."""
    B, T, C = x.shape
    H, _, hs = wq.shape
    q = jnp.einsum("btc,hcd->bhtd", x, wq)
    k = jnp.einsum("btc,hcd->bhtd", x, wk)
    v = jnp.einsum("btc,hcd->bhtd", x, wv)
    wei = jnp.einsum("bhtd,bhsd->bhts", q, k) * C ** (-0.5)
    mask = jnp.tril(jnp.ones((T, T), dtype=bool))
    wei = jnp.where(mask, wei, -jnp.inf)
    wei = jax.nn.softmax(wei, axis=-1)
    out = jnp.einsum("bhts,bhsd->bhtd", wei, v)            # (B, H, T, hs)
    cat = jnp.transpose(out, (0, 2, 1, 3)).reshape(B, T, H * hs)
    return cat @ wp_t + bp[0]


if __name__ == "__main__":
    n_embd = 16
    block_size = 8
    num_heads = 4
    head_size = n_embd // num_heads   # 4, so concat of heads has dim n_embd
    B, T, C = 2, block_size, n_embd

    key = jax.random.PRNGKey(0)
    kx, kq, kk, kv, kp, kb = jax.random.split(key, 6)

    x = jax.random.normal(kx, (B, T, C), dtype=jnp.float32)
    # Per-head projection weights as (H, C, hs); equivalent to nn.Linear(C, hs).weight.T per head.
    wq = jax.random.normal(kq, (num_heads, C, head_size), dtype=jnp.float32) * (C ** -0.5)
    wk = jax.random.normal(kk, (num_heads, C, head_size), dtype=jnp.float32) * (C ** -0.5)
    wv = jax.random.normal(kv, (num_heads, C, head_size), dtype=jnp.float32) * (C ** -0.5)
    # Output projection: nn.Linear(n_embd, n_embd); store the transposed weight (in, out).
    wp_t = jax.random.normal(kp, (C, C), dtype=jnp.float32) * (C ** -0.5)
    bp = jax.random.normal(kb, (1, C), dtype=jnp.float32) * 0.01

    out = multi_head_attn(x, wq, wk, wv, wp_t, bp, batch_block=1)
    out = jax.block_until_ready(out)

    ref = _reference(x, wq, wk, wv, wp_t, bp)
    assert out.shape == (B, T, C)
    assert jnp.allclose(out, ref, atol=1e-5, rtol=1e-5), "Pallas output mismatch vs reference"

    print("KERNEL_OK")
</pallas_src>

<mosaic_0001>
module attributes {stable_mosaic.version = 11 : i64} {
  func.func @_mha_kernel(%arg0: i32, %arg1: memref<8x16xf32, #tpu.memory_space<vmem>>, %arg2: memref<16x48xf32, #tpu.memory_space<vmem>>, %arg3: memref<16x16xf32, #tpu.memory_space<vmem>>, %arg4: memref<1x16xf32, #tpu.memory_space<vmem>>, %arg5: memref<8x16xf32, #tpu.memory_space<vmem>>, %arg6: memref<8x16xf32, #tpu.memory_space<vmem>>) attributes {dimension_semantics = [#tpu.dimension_semantics<parallel>], iteration_bounds = array<i64: 2>, scalar_prefetch = 0 : i64, scratch_operands = 1 : i64, tpu.core_type = #tpu.core_type<tc>, window_params = [{transform_indices = @transform_0, window_bounds = array<i64: 8, 16>}, {pipeline_mode = #tpu.pipeline_mode<synchronous>, transform_indices = @transform_1, window_bounds = array<i64: 16, 48>}, {pipeline_mode = #tpu.pipeline_mode<synchronous>, transform_indices = @transform_2, window_bounds = array<i64: 16, 16>}, {pipeline_mode = #tpu.pipeline_mode<synchronous>, transform_indices = @transform_3, window_bounds = array<i64: 1, 16>}, {transform_indices = @transform_4, window_bounds = array<i64: 8, 16>}]} {
    %0 = tpu.iota {dimensions = array<i32: 0>} : vector<8x8xi32>
    %1 = tpu.iota {dimensions = array<i32: 1>} : vector<8x8xi32>
    %2 = arith.cmpi sge, %0, %1 : vector<8x8xi32>
    %cst = arith.constant 0.000000e+00 : f32
    %cst_0 = arith.constant -1.000000e+30 : f32
    %3 = vector.broadcast %cst : f32 to vector<8x8xf32>
    %4 = vector.broadcast %cst_0 : f32 to vector<8x8xf32>
    %5 = arith.select %2, %3, %4 : vector<8x8xi1>, vector<8x8xf32>
    %c0 = arith.constant 0 : index
    %c0_1 = arith.constant 0 : index
    %6 = vector.load %arg1[%c0, %c0_1] : memref<8x16xf32, #tpu.memory_space<vmem>>, vector<8x16xf32>
    %c0_2 = arith.constant 0 : index
    %c0_3 = arith.constant 0 : index
    %7 = vector.load %arg2[%c0_2, %c0_3] : memref<16x48xf32, #tpu.memory_space<vmem>>, vector<16x48xf32>
    %c0_4 = arith.constant 0 : index
    %c0_5 = arith.constant 0 : index
    %8 = vector.load %arg3[%c0_4, %c0_5] : memref<16x16xf32, #tpu.memory_space<vmem>>, vector<16x16xf32>
    %c0_6 = arith.constant 0 : index
    %c0_7 = arith.constant 0 : index
    %9 = vector.load %arg4[%c0_6, %c0_7] : memref<1x16xf32, #tpu.memory_space<vmem>>, vector<1x16xf32>
    %cst_8 = arith.constant dense<0.000000e+00> : vector<8x48xf32>
    %10 = tpu.matmul %6, %7, %cst_8 {dimension_numbers = #tpu.dot_dimension_numbers<[1], [0], [0], [1], [0, 0, 1, 1], [], []>} : vector<8x16xf32>, vector<16x48xf32>, vector<8x48xf32> -> vector<8x48xf32>
    %11 = vector.extract_strided_slice %10 {offsets = [0, 0], sizes = [8, 16], strides = [1, 1]} : vector<8x48xf32> to vector<8x16xf32>
    %cst_9 = arith.constant 2.500000e-01 : f32
    %12 = vector.broadcast %cst_9 : f32 to vector<8x16xf32>
    %13 = arith.mulf %11, %12 : vector<8x16xf32>
    %14 = vector.extract_strided_slice %10 {offsets = [0, 16], sizes = [8, 16], strides = [1, 1]} : vector<8x48xf32> to vector<8x16xf32>
    %15 = vector.extract_strided_slice %10 {offsets = [0, 32], sizes = [8, 16], strides = [1, 1]} : vector<8x48xf32> to vector<8x16xf32>
    %16 = vector.extract_strided_slice %13 {offsets = [0, 0], sizes = [8, 4], strides = [1, 1]} : vector<8x16xf32> to vector<8x4xf32>
    %17 = vector.extract_strided_slice %14 {offsets = [0, 0], sizes = [8, 4], strides = [1, 1]} : vector<8x16xf32> to vector<8x4xf32>
    %18 = vector.extract_strided_slice %15 {offsets = [0, 0], sizes = [8, 4], strides = [1, 1]} : vector<8x16xf32> to vector<8x4xf32>
    %cst_10 = arith.constant dense<0.000000e+00> : vector<8x8xf32>
    %19 = tpu.matmul %16, %17, %cst_10 {dimension_numbers = #tpu.dot_dimension_numbers<[1], [1], [0], [0], [0, 0, 1, 0], [], []>} : vector<8x4xf32>, vector<8x4xf32>, vector<8x8xf32> -> vector<8x8xf32>
    %20 = arith.addf %19, %5 : vector<8x8xf32>
    %cst_11 = arith.constant dense<0xFF800000> : vector<8xf32>
    %21 = vector.multi_reduction <maximumf>, %20, %cst_11 [1] : vector<8x8xf32> to vector<8xf32>
    %22 = vector.shape_cast %21 : vector<8xf32> to vector<8x1xf32>
    %23 = vector.broadcast %22 : vector<8x1xf32> to vector<8x8xf32>
    %24 = arith.subf %20, %23 : vector<8x8xf32>
    %25 = math.exp %24 : vector<8x8xf32>
    %cst_12 = arith.constant dense<0.000000e+00> : vector<8xf32>
    %26 = vector.multi_reduction <add>, %25, %cst_12 [1] : vector<8x8xf32> to vector<8xf32>
    %27 = vector.shape_cast %26 : vector<8xf32> to vector<8x1xf32>
    %28 = tpu.reciprocal %27 : vector<8x1xf32> -> vector<8x1xf32>
    %29 = vector.broadcast %28 : vector<8x1xf32> to vector<8x8xf32>
    %30 = arith.mulf %25, %29 : vector<8x8xf32>
    %cst_13 = arith.constant dense<0.000000e+00> : vector<8x4xf32>
    %31 = tpu.matmul %30, %18, %cst_13 {dimension_numbers = #tpu.dot_dimension_numbers<[1], [0], [0], [1], [0, 0, 1, 1], [], []>} : vector<8x8xf32>, vector<8x4xf32>, vector<8x4xf32> -> vector<8x4xf32>
    %c0_14 = arith.constant 0 : index
    %c0_15 = arith.constant 0 : index
    %32 = vector.load %arg6[%c0_14, %c0_15] : memref<8x16xf32, #tpu.memory_space<vmem>>, vector<8x4xf32>
    tpu.vector_store %arg6[%c0_14, %c0_15], %31 {strides = array<i32>} : memref<8x16xf32, #tpu.memory_space<vmem>>, vector<8x4xf32>,
    %33 = vector.extract_strided_slice %13 {offsets = [0, 4], sizes = [8, 4], strides = [1, 1]} : vector<8x16xf32> to vector<8x4xf32>
    %34 = vector.extract_strided_slice %14 {offsets = [0, 4], sizes = [8, 4], strides = [1, 1]} : vector<8x16xf32> to vector<8x4xf32>
    %35 = vector.extract_strided_slice %15 {offsets = [0, 4], sizes = [8, 4], strides = [1, 1]} : vector<8x16xf32> to vector<8x4xf32>
    %cst_16 = arith.constant dense<0.000000e+00> : vector<8x8xf32>
    %36 = tpu.matmul %33, %34, %cst_16 {dimension_numbers = #tpu.dot_dimension_numbers<[1], [1], [0], [0], [0, 0, 1, 0], [], []>} : vector<8x4xf32>, vector<8x4xf32>, vector<8x8xf32> -> vector<8x8xf32>
    %37 = arith.addf %36, %5 : vector<8x8xf32>
    %cst_17 = arith.constant dense<0xFF800000> : vector<8xf32>
    %38 = vector.multi_reduction <maximumf>, %37, %cst_17 [1] : vector<8x8xf32> to vector<8xf32>
    %39 = vector.shape_cast %38 : vector<8xf32> to vector<8x1xf32>
    %40 = vector.broadcast %39 : vector<8x1xf32> to vector<8x8xf32>
    %41 = arith.subf %37, %40 : vector<8x8xf32>
    %42 = math.exp %41 : vector<8x8xf32>
    %cst_18 = arith.constant dense<0.000000e+00> : vector<8xf32>
    %43 = vector.multi_reduction <add>, %42, %cst_18 [1] : vector<8x8xf32> to vector<8xf32>
    %44 = vector.shape_cast %43 : vector<8xf32> to vector<8x1xf32>
    %45 = tpu.reciprocal %44 : vector<8x1xf32> -> vector<8x1xf32>
    %46 = vector.broadcast %45 : vector<8x1xf32> to vector<8x8xf32>
    %47 = arith.mulf %42, %46 : vector<8x8xf32>
    %cst_19 = arith.constant dense<0.000000e+00> : vector<8x4xf32>
    %48 = tpu.matmul %47, %35, %cst_19 {dimension_numbers = #tpu.dot_dimension_numbers<[1], [0], [0], [1], [0, 0, 1, 1], [], []>} : vector<8x8xf32>, vector<8x4xf32>, vector<8x4xf32> -> vector<8x4xf32>
    %c0_20 = arith.constant 0 : index
    %c4 = arith.constant 4 : index
    %49 = vector.load %arg6[%c0_20, %c4] : memref<8x16xf32, #tpu.memory_space<vmem>>, vector<8x4xf32>
    tpu.vector_store %arg6[%c0_20, %c4], %48 {strides = array<i32>} : memref<8x16xf32, #tpu.memory_space<vmem>>, vector<8x4xf32>,
    %50 = vector.extract_strided_slice %13 {offsets = [0, 8], sizes = [8, 4], strides = [1, 1]} : vector<8x16xf32> to vector<8x4xf32>
    %51 = vector.extract_strided_slice %14 {offsets = [0, 8], sizes = [8, 4], strides = [1, 1]} : vector<8x16xf32> to vector<8x4xf32>
    %52 = vector.extract_strided_slice %15 {offsets = [0, 8], sizes = [8, 4], strides = [1, 1]} : vector<8x16xf32> to vector<8x4xf32>
    %cst_21 = arith.constant dense<0.000000e+00> : vector<8x8xf32>
    %53 = tpu.matmul %50, %51, %cst_21 {dimension_numbers = #tpu.dot_dimension_numbers<[1], [1], [0], [0], [0, 0, 1, 0], [], []>} : vector<8x4xf32>, vector<8x4xf32>, vector<8x8xf32> -> vector<8x8xf32>
    %54 = arith.addf %53, %5 : vector<8x8xf32>
    %cst_22 = arith.constant dense<0xFF800000> : vector<8xf32>
    %55 = vector.multi_reduction <maximumf>, %54, %cst_22 [1] : vector<8x8xf32> to vector<8xf32>
    %56 = vector.shape_cast %55 : vector<8xf32> to vector<8x1xf32>
    %57 = vector.broadcast %56 : vector<8x1xf32> to vector<8x8xf32>
    %58 = arith.subf %54, %57 : vector<8x8xf32>
    %59 = math.exp %58 : vector<8x8xf32>
    %cst_23 = arith.constant dense<0.000000e+00> : vector<8xf32>
    %60 = vector.multi_reduction <add>, %59, %cst_23 [1] : vector<8x8xf32> to vector<8xf32>
    %61 = vector.shape_cast %60 : vector<8xf32> to vector<8x1xf32>
    %62 = tpu.reciprocal %61 : vector<8x1xf32> -> vector<8x1xf32>
    %63 = vector.broadcast %62 : vector<8x1xf32> to vector<8x8xf32>
    %64 = arith.mulf %59, %63 : vector<8x8xf32>
    %cst_24 = arith.constant dense<0.000000e+00> : vector<8x4xf32>
    %65 = tpu.matmul %64, %52, %cst_24 {dimension_numbers = #tpu.dot_dimension_numbers<[1], [0], [0], [1], [0, 0, 1, 1], [], []>} : vector<8x8xf32>, vector<8x4xf32>, vector<8x4xf32> -> vector<8x4xf32>
    %c0_25 = arith.constant 0 : index
    %c8 = arith.constant 8 : index
    %66 = vector.load %arg6[%c0_25, %c8] : memref<8x16xf32, #tpu.memory_space<vmem>>, vector<8x4xf32>
    tpu.vector_store %arg6[%c0_25, %c8], %65 {strides = array<i32>} : memref<8x16xf32, #tpu.memory_space<vmem>>, vector<8x4xf32>,
    %67 = vector.extract_strided_slice %13 {offsets = [0, 12], sizes = [8, 4], strides = [1, 1]} : vector<8x16xf32> to vector<8x4xf32>
    %68 = vector.extract_strided_slice %14 {offsets = [0, 12], sizes = [8, 4], strides = [1, 1]} : vector<8x16xf32> to vector<8x4xf32>
    %69 = vector.extract_strided_slice %15 {offsets = [0, 12], sizes = [8, 4], strides = [1, 1]} : vector<8x16xf32> to vector<8x4xf32>
    %cst_26 = arith.constant dense<0.000000e+00> : vector<8x8xf32>
    %70 = tpu.matmul %67, %68, %cst_26 {dimension_numbers = #tpu.dot_dimension_numbers<[1], [1], [0], [0], [0, 0, 1, 0], [], []>} : vector<8x4xf32>, vector<8x4xf32>, vector<8x8xf32> -> vector<8x8xf32>
    %71 = arith.addf %70, %5 : vector<8x8xf32>
    %cst_27 = arith.constant dense<0xFF800000> : vector<8xf32>
    %72 = vector.multi_reduction <maximumf>, %71, %cst_27 [1] : vector<8x8xf32> to vector<8xf32>
    %73 = vector.shape_cast %72 : vector<8xf32> to vector<8x1xf32>
    %74 = vector.broadcast %73 : vector<8x1xf32> to vector<8x8xf32>
    %75 = arith.subf %71, %74 : vector<8x8xf32>
    %76 = math.exp %75 : vector<8x8xf32>
    %cst_28 = arith.constant dense<0.000000e+00> : vector<8xf32>
    %77 = vector.multi_reduction <add>, %76, %cst_28 [1] : vector<8x8xf32> to vector<8xf32>
    %78 = vector.shape_cast %77 : vector<8xf32> to vector<8x1xf32>
    %79 = tpu.reciprocal %78 : vector<8x1xf32> -> vector<8x1xf32>
    %80 = vector.broadcast %79 : vector<8x1xf32> to vector<8x8xf32>
    %81 = arith.mulf %76, %80 : vector<8x8xf32>
    %cst_29 = arith.constant dense<0.000000e+00> : vector<8x4xf32>
    %82 = tpu.matmul %81, %69, %cst_29 {dimension_numbers = #tpu.dot_dimension_numbers<[1], [0], [0], [1], [0, 0, 1, 1], [], []>} : vector<8x8xf32>, vector<8x4xf32>, vector<8x4xf32> -> vector<8x4xf32>
    %c0_30 = arith.constant 0 : index
    %c12 = arith.constant 12 : index
    %83 = vector.load %arg6[%c0_30, %c12] : memref<8x16xf32, #tpu.memory_space<vmem>>, vector<8x4xf32>
    tpu.vector_store %arg6[%c0_30, %c12], %82 {strides = array<i32>} : memref<8x16xf32, #tpu.memory_space<vmem>>, vector<8x4xf32>,
    %c0_31 = arith.constant 0 : index
    %c0_32 = arith.constant 0 : index
    %84 = vector.load %arg6[%c0_31, %c0_32] : memref<8x16xf32, #tpu.memory_space<vmem>>, vector<8x16xf32>
    %cst_33 = arith.constant dense<0.000000e+00> : vector<8x16xf32>
    %85 = tpu.matmul %84, %8, %cst_33 {dimension_numbers = #tpu.dot_dimension_numbers<[1], [0], [0], [1], [0, 0, 1, 1], [], []>} : vector<8x16xf32>, vector<16x16xf32>, vector<8x16xf32> -> vector<8x16xf32>
    %86 = vector.broadcast %9 : vector<1x16xf32> to vector<8x16xf32>
    %87 = arith.addf %85, %86 : vector<8x16xf32>
    %c0_34 = arith.constant 0 : index
    %c0_35 = arith.constant 0 : index
    %88 = vector.load %arg5[%c0_34, %c0_35] : memref<8x16xf32, #tpu.memory_space<vmem>>, vector<8x16xf32>
    tpu.vector_store %arg5[%c0_34, %c0_35], %87 {strides = array<i32>} : memref<8x16xf32, #tpu.memory_space<vmem>>, vector<8x16xf32>,
    return
  }
  func.func @transform_0(%arg0: i32) -> (i32, i32) {
    %c0_i32 = arith.constant 0 : i32
    %c0_i32_0 = arith.constant 0 : i32
    return %arg0, %c0_i32 : i32, i32
  }
  func.func @transform_1(%arg0: i32) -> (i32, i32) {
    %c0_i32 = arith.constant 0 : i32
    %c0_i32_0 = arith.constant 0 : i32
    %c0_i32_1 = arith.constant 0 : i32
    return %c0_i32, %c0_i32_0 : i32, i32
  }
  func.func @transform_2(%arg0: i32) -> (i32, i32) {
    %c0_i32 = arith.constant 0 : i32
    %c0_i32_0 = arith.constant 0 : i32
    %c0_i32_1 = arith.constant 0 : i32
    return %c0_i32, %c0_i32_0 : i32, i32
  }
  func.func @transform_3(%arg0: i32) -> (i32, i32) {
    %c0_i32 = arith.constant 0 : i32
    %c0_i32_0 = arith.constant 0 : i32
    %c0_i32_1 = arith.constant 0 : i32
    return %c0_i32, %c0_i32_0 : i32, i32
  }
  func.func @transform_4(%arg0: i32) -> (i32, i32) {
    %c0_i32 = arith.constant 0 : i32
    %c0_i32_0 = arith.constant 0 : i32
    return %arg0, %c0_i32 : i32, i32
  }
}

</mosaic_0001>

<bundles_post_ra>
// kernel: tpu_custom_call.1
= control target key start
LH: loop header
LB: loop body
LE: loop exit
PB: predicated region body
PF: predicated region fallthrough
CT: control target
= control target key end

     0   :  { %9 = vsyncpa [#allocation4], 0  ;;  %s1846_s0 = inlined_call_operand.hbm [shape: f32[16,16], index: 0, kind: input, shape index: {}]   ;;  %s1847_s1 = inlined_call_operand.hbm [shape: f32[16,48], index: 1, kind: input, shape index: {}]   ;;  %s1848_s2 = inlined_call_operand.hbm [shape: f32[16,16], index: 2, kind: input, shape index: {}]   ;;  %s1849_s3 = inlined_call_operand.vmem [shape: f32[1,16], index: 3, kind: input, shape index: {}]   ;;  %s1850_s4 = inlined_call_operand.hbm [shape: f32[16,16], index: 4, kind: output, shape index: {}]  }
   0x1   :  { %11 = vsyncpa [#allocation4 + $0x1], 0 }
   0x2   :  { %12 = vsyncpa [#allocation7], 0 }
   0x3   :  { %13 = vsyncpa [#allocation5], 0 }
   0x4   :  { %15 = vsyncpa [#allocation5 + $0x1], 0  ;;  %s1601_s15 = smov 0   ;;  %s1603_s16 = smov 0  }
   0x5   :  { %s1605_s17 = smov 0   ;;  %s1607_s18 = smov 0  }
   0x6 LB: > { %s1622_s19 = sadd.s32 4294967295, %s1551_s18   ;;  %s1194_s20 = sadd.s32 4294967294, %s1551_s18   ;;  %s1551_s18 = sphi %s1607_s18, %s1872_s18   ;;  %s1547_s17 = sphi %s1605_s17, %s1871_s17   ;;  %s1543_s16 = sphi %s1603_s16, %s1870_s16   ;;  %s1539_s15 = sphi %s1601_s15, %s1869_s15  }
   0x7   : > { %p41_p0 = scmp.ne.s32.totalorder %s1543_s16, %s1539_s15  ;;  %p1851_p1 = scmp.eq.s32.totalorder %s1622_s19, 0 }
   0x8   : > { %p134_p3 = scmp.eq.s32.totalorder %s1194_s20, 1  ;;  %p1195_p5 = scmp.ge.s32.totalorder %s1551_s18, 1 }
   0x9   : > { %p1631_p4 = por %p1851_p1, %p41_p0  ;;  %p141_p7 = scmp.lt.s32.totalorder %s1551_s18, 3 }
   0xa   : > { %p1636_p6 = por %p134_p3, %p41_p0  ;;  %s1553_s24 = smov [#allocation6]  }
   0xb   : > { %s1855_s21 = scalar_select %p1631_p4, 1, 0 }
   0xc   : > { %s1856_s22 = scalar_select %p1636_p6, 1, 0 }
   0xd   : > { %p1641_p8 = pnand %p1195_p5, %p141_p7  ;;  %s153_s25 = sshll.u32 %s1553_s24, 4  ;;  %s154_s25 = int_to_ptr.vmem [resolvable:$true] %s153_s25 }
   0xe   : > { %s1554_s27 = smov [#allocation8]   ;;  %s1414_s29 = scalar_lea.vmem %s154_s25, 256 }
   0xf   : > { %s1857_s23 = scalar_select %p1641_p8, 1, 0 }
  0x10   : > { %p1313_p9 = pneg %p1641_p8  ;;  %s166_s28 = sshll.u32 %s1554_s27, 4  ;;  %s167_s28 = int_to_ptr.vmem [resolvable:$true] %s166_s28 }
  0x11   : > { %p1415_p13 = scmp.ne.s32.totalorder %s154_s25, %s1414_s29  ;;  %p1422_p5 = scmp.lt.s32.totalorder %s154_s25, %s154_s25 }
  0x12   : > { %p1650_p11 = pnand %p1313_p9, %p1851_p1  ;;  %p1423_p7 = scmp.lt.s32.totalorder %s1414_s29, %s1414_s29 }
  0x14   : > { %p1405_p12 = pneg %p1650_p11  ;;  %p1424_p10 = por %p1423_p7, %p1422_p5 }
  0x16   : > { %p1417_p0 = pnand %p1415_p13, %p1405_p12 }
  0x18   : > { %p1418_p3 = pneg %p1417_p0 }
  0x1a   : > { %p1425_p9 = pnand %p1424_p10, %p1418_p3 }
  0x1c   : > { %1428 = shalt.err (!%p1425_p9)
}
  0x1d   : > { %s1555_s30 = smov 128   ;;  %s1556_s5 = smov 8  }
  0x1e   : > { %1316 = dma.hbm_to_vmem [thread:$0]  (!%p1650_p11), %s1847_s1, 256, %s154_s25, [#allocation7], %s1555_s30, %s1555_s30, %s1556_s5  }
  0x1f   : > { %s1440_s8 = scalar_lea.vmem %s167_s28, 256  ;;  %p1448_p2 = scmp.lt.s32.totalorder %s167_s28, %s167_s28 }
  0x20   : > { %p1441_p1 = scmp.ne.s32.totalorder %s167_s28, %s1440_s8  ;;  %p1449_p6 = scmp.lt.s32.totalorder %s1440_s8, %s1440_s8 }
  0x22   : > { %p1443_p13 = pnand %p1441_p1, %p1405_p12  ;;  %p1450_p5 = por %p1449_p6, %p1448_p2 }
  0x24   : > { %p1444_p0 = pneg %p1443_p13 }
  0x26   : > { %p1451_p10 = pnand %p1450_p5, %p1444_p0 }
  0x28   : > { %1454 = shalt.err (!%p1451_p10)
}
  0x29   : > { %1319 = dma.hbm_to_vmem [thread:$0]  (!%p1650_p11), %s1848_s2, 256, %s167_s28, [#allocation7], %s1555_s30, %s1555_s30, %s1556_s5  }
  0x2a   : > { %s1673_s11 = sadd.s32 1, %s1551_s18   ;;  %s28_s12 = sadd.s32 1, %s1547_s17 }
  0x2b   : > { %s25_s13 = ssub.s32 %s1551_s18, %s1673_s11  ;;  %p35_p1 = scmp.ne.s32.totalorder %s1547_s17, %s1543_s16 }
  0x2c   : > { %p26_p2 = scmp.eq.s32.totalorder %s25_s13, 0  ;;  %p36_p6 = scmp.eq.s32.totalorder %s1551_s18, 0 }
  0x2d   : > { %p1859_p12 = scmp.eq.s32.totalorder %s1622_s19, 1  ;;  %p1330_p7 = scmp.lt.s32.totalorder %s1551_s18, 2 }
  0x2e   : > { %s1689_s20 = scalar_select %p26_p2, %s1547_s17, %s28_s12  }
  0x2f   : > { %p1683_p3 = por %p1859_p12, %p35_p1  ;;  %p37_p9 = por %p36_p6, %p35_p1 }
  0x30   : > { %s183_s24 = sand.u32 1, %s1547_s17   ;;  %s1200_s26 = sshll.u32 %s1551_s18, 7 }
  0x31   : > { %s1860_s14 = scalar_select %p1683_p3, 1, 0 }
  0x32   : > { %s1199_s25 = sshll.u32 %s183_s24, 3  ;;  %s1696_s29 = scalar_lea.hbm %s1846_s0, %s1200_s26 }
  0x33   : > { %s187_s30 = scalar_lea.vmem [#allocation3], %s1199_s25  ;;  %p1698_p11 = pnand %p1330_p7, %p37_p9 }
  0x34   : > { %s194_s5 = sshll.u32 %s187_s30, 4  ;;  %s184_s7 = scalar_lea.sflag [#allocation4], %s183_s24  ;;  %s195_s5 = int_to_ptr.vmem [resolvable:$true] %s194_s5 }
  0x35   : > { %s1455_s8 = scalar_lea.hbm %s1696_s29, 128  ;;  %p1457_p0 = pneg %p1698_p11 }
  0x36   : > { %p1456_p13 = scmp.ne.s32.totalorder %s1696_s29, %s1455_s8  ;;  %s1460_s12 = scalar_lea.hbm %s1846_s0, 256 }
  0x37   : > { %p1461_p1 = scmp.lt.s32.totalorder %s1696_s29, %s1846_s0  ;;  %p1462_p2 = scmp.lt.s32.totalorder %s1460_s12, %s1455_s8 }
  0x38   : > { %p1458_p5 = pnand %p1457_p0, %p1456_p13 }
  0x39   : > { %p1463_p6 = por %p1462_p2, %p1461_p1 }
  0x3a   : > { %p1459_p10 = pneg %p1458_p5 }
  0x3c   : > { %p1464_p12 = pnand %p1463_p6, %p1459_p10 }
  0x3e   : > { %1467 = shalt.err (!%p1464_p12)
}
  0x3f   : > { %s1468_s26 = scalar_lea.vmem %s195_s5, 128  ;;  %s1557_s24 = smov [#allocation3]  }
  0x40   : > { %p1469_p7 = scmp.ne.s32.totalorder %s195_s5, %s1468_s26  ;;  %s1473_s27 = sshll.u32 %s1557_s24, 4  ;;  %s1474_s27 = int_to_ptr.vmem [resolvable:$false] %s1473_s27 }
  0x41   : > { %s1475_s28 = scalar_lea.vmem %s1474_s27, 256  ;;  %p1476_p13 = scmp.lt.s32.totalorder %s195_s5, %s1474_s27 }
  0x42   : > { %p1471_p9 = pnand %p1469_p7, %p1457_p0  ;;  %p1477_p5 = scmp.lt.s32.totalorder %s1475_s28, %s1468_s26 }
  0x44   : > { %p1472_p3 = pneg %p1471_p9  ;;  %p1478_p4 = por %p1477_p5, %p1476_p13 }
  0x46   : > { %p1479_p8 = pnand %p1478_p4, %p1472_p3 }
  0x48   : > { %1482 = shalt.err (!%p1479_p8)
}
  0x49   : > { %1323 = dma.hbm_to_vmem [thread:$0]  (!%p1698_p11), %s1696_s29, 128, %s195_s5, %s184_s7  }
  0x4a   : > { %p1862_p10 = scmp.ne.s32.totalorder %s1857_s23, 0 }
  0x4b   : > { %s1719_s30 = sand.u32 (!%p1862_p10), 1, %s1543_s16   ;;  %p1863_p4 = scmp.ne.s32.totalorder (!%p1862_p10), %s1855_s21, 0 }
  0x4c   : > { %203 = sbr.rel (%p1862_p10) target bundleno = 1490 (0x5d2), region = 36  ;;  %s1202_s8 = sshll.u32 (!%p1862_p10), %s1719_s30, 3 }
  0x4d   : > { %s206_s9 = scalar_lea.sflag (!%p1862_p10), [#allocation4], %s1719_s30  ;;  %s209_s10 = scalar_lea.vmem (!%p1862_p10), [#allocation3], %s1202_s8 }
  0x51   : > { %1526 = dma.done.wait (%p1863_p4), %s206_s9, 128  }
  0x52   : > { %1528 = vsyncadd (%p1863_p4), %s206_s9, 4294967168  ;;  %p1864_p8 = scmp.eq.s32.totalorder %s1622_s19, 0 }
  0x54   : > { %1530 = dma.done.wait (%p1864_p8), [#allocation7], 512   ;;  %p1865_p3 = pmov %p1864_p8 }
  0x55   : > { %v1558_v0 = vmov 0.0   ;;  %vm1559_vm0 = vmmov 0   ;;  %v250_v1 = vld [vmem:[#allocation6 + $0x8] sm:$0xff]  ;;  %v249_v2 = vld [vmem:[#allocation6] sm:$0xff]  ;;  %v248_v3 = vld [vmem:[%s209_s10] sm:$0xff]  ;;  %vm254_vm1 = vcmask 130048   ;;  %v242_v14 = vlaneseq }
  0x56   : > { %1532 = vsyncadd (%p1865_p3), [#allocation7], 4294966784  ;;  %1247 = vmatprep.subr.mxu0 %v1558_v0  ;;  %1251 = vmatprep.mubr.msk.f32.mxu0 %vm1559_vm0, %v1558_v0  ;;  %s1560_s21 = smov 112   ;;  %s1561_s23 = smov 124   ;;  %vm332_vm2 = vcmask 31744   ;;  %vm408_vm4 = vcmask 64512  }
  0x57   : > { %1254 = vmatprep.subr.mxu1 %v1558_v0  ;;  %1256 = vmatprep.mubr.msk.f32.mxu1 %vm1559_vm0, %v1558_v0  ;;  %s1562_s29 = smov 108   ;;  %s1563_s5 = smov 104   ;;  %v243_v15 = vshrl.u32 %v242_v14, 7  ;;  %v245_v16 = vand.u32 127, %v242_v14  ;;  %v1567_v17 = vmov -1e+30  }
  0x58   : > { %1248 = vmatpush3.msra.mxu0 %v250_v1  ;;  %s1564_s6 = smov 120   ;;  %s1565_s7 = smov 100   ;;  %vm666_vm5 = vcmask 64544   ;;  %vm837_vm6 = vcmask 97344   ;;  %vm1008_vm7 = vcmask 130144  }
  0x59   : > { %1249 = vmatprep.subr.mxu0 %v1558_v0  ;;  %s1566_s12 = smov 116   ;;  %vm246_vm3 = vcmp.ge.s32.totalorder %v243_v15, %v245_v16  ;;  %s1568_s13 = smov 92  }
  0x5a   : > { %1250 = vmatpush3.msra.mxu0 %v249_v2  ;;  %v247_v18 = vsel %vm246_vm3, 0.0, %v1567_v17  ;;  %s1569_s25 = smov 96   ;;  %s1570_s26 = smov 88  }
  0x5b   : > { %1252 = vmatmul.mubr.msk.f32.vlgmr.msra.gmra.mxu0 %vm254_vm1, %v248_v3  ;;  %1259 = vmatprep.subr.mxu0 %v1558_v0  ;;  %s1571_s24 = smov 84   ;;  %s1572_s27 = smov 4  }
  0x5c   : > { %1261 = vmatprep.mubr.msk.f32.mxu0 %vm1559_vm0, %v1558_v0  ;;  %s1573_s28 = smov 8   ;;  %s1574_s9 = smov 12  }
  0x5d   : > { %p1866_p0 = scmp.ne.s32.totalorder %s1860_s14, 0 }
 0x11b   : > { %v1744_v4 = vpop.f32.mrf.mxu0 }
 0x11c   : > { %330 = vrot.lane.b32.xlu0 %v1744_v4, %s1560_s21  ;;  %v328_v5 = vmul.f32 0.25, %v1744_v4 }
 0x11d   : > { %v1253_v6 = vpop.f32.mrf.mxu0 }
 0x11e   : > { %497 = vrot.lane.b32.xlu1 %v328_v5, %s1561_s23  ;;  %s1222_s23 = sshll.u32 %s1622_s19, 7  ;;  %s1575_s19 = smov [#allocation9]  }
 0x120   : > { %499 = vrot.lane.b32.xlu0 %v1744_v4, %s1562_s29  ;;  %s241_s29 = scalar_lea.vmem [#allocation9], %s1202_s8  ;;  %s1487_s8 = sshll.u32 %s1575_s19, 4  ;;  %s1488_s8 = int_to_ptr.vmem [resolvable:$false] %s1487_s8 }
 0x122   : > { %670 = vrot.lane.b32.xlu1 %v1744_v4, %s1563_s5  ;;  %s1105_s5 = sshll.u32 %s241_s29, 4  ;;  %s1106_s5 = int_to_ptr.vmem [resolvable:$true] %s1105_s5 }
 0x123   : > { %p1490_p6 = scmp.lt.s32.totalorder %s1106_s5, %s1488_s8 }
 0x124   : > { %668 = vrot.lane.b32.xlu0 %v328_v5, %s1564_s6 }
 0x126   : > { %841 = vrot.lane.b32.xlu1 %v1744_v4, %s1565_s7 }
 0x128   : > { %839 = vrot.lane.b32.xlu0 %v328_v5, %s1566_s12  ;;  %s1808_s12 = scalar_lea.hbm %s1850_s4, %s1222_s23 }
 0x18e   : > { %v331_v7 = vpop.permute.xlu0 %330 }
 0x18f   : > { %1255 = vmatpush3.xpose.msk.msra.mxu1 %vm332_vm2, %v331_v7 }
 0x190   : > { %v498_v8 = vpop.permute.xlu1 %497  ;;  %1264 = vmatprep.subr.mxu1 %v1558_v0 }
 0x192   : > { %v500_v9 = vpop.permute.xlu0 %499  ;;  %1257 = vmatmul.mubr.msk.f32.vlgmr.msra.gmra.mxu1 %vm332_vm2, %v328_v5 }
 0x193   : > { %1265 = vmatpush3.xpose.msk.msra.mxu1 %vm332_vm2, %v500_v9  ;;  %1266 = vmatprep.mubr.msk.f32.mxu1 %vm1559_vm0, %v1558_v0 }
 0x194   : > { %v671_v10 = vpop.permute.xlu1 %670  ;;  %1274 = vmatprep.subr.mxu1 %v1558_v0 }
 0x196   : > { %1267 = vmatmul.mubr.msk.f32.vlgmr.msra.gmra.mxu1 %vm332_vm2, %v498_v8  ;;  %v669_v11 = vpop.permute.xlu0 %668 }
 0x197   : > { %1275 = vmatpush3.xpose.msk.msra.mxu1 %vm332_vm2, %v671_v10  ;;  %1276 = vmatprep.mubr.msk.f32.mxu1 %vm1559_vm0, %v1558_v0 }
 0x198   : > { %1284 = vmatprep.subr.mxu1 %v1558_v0  ;;  %v842_v12 = vpop.permute.xlu1 %841 }
 0x19a   : > { %1277 = vmatmul.mubr.msk.f32.vlgmr.msra.gmra.mxu1 %vm332_vm2, %v669_v11  ;;  %v840_v13 = vpop.permute.xlu0 %839 }
 0x19b   : > { %1285 = vmatpush3.xpose.msk.msra.mxu1 %vm332_vm2, %v842_v12  ;;  %1286 = vmatprep.mubr.msk.f32.mxu1 %vm1559_vm0, %v1558_v0  ;;  %v252_v12 = vld [vmem:[#allocation8 + $0x8] sm:$0xff] }
 0x19c   : > { %1294 = vmatprep.subr.mxu1 %v1558_v0 }
 0x19e   : > { %1287 = vmatmul.mubr.msk.f32.vlgmr.msra.gmra.mxu1 %vm332_vm2, %v840_v13  ;;  %v251_v13 = vld [vmem:[#allocation8] sm:$0xff] }
 0x19f   : > { %1298 = vmatprep.mubr.msk.f32.mxu1 %vm1559_vm0, %v1558_v0  ;;  %1295 = vmatpush3.msra.mxu1 %v252_v12 }
 0x1a0   : > { %1296 = vmatprep.subr.mxu1 %v1558_v0 }
 0x1a1   : > { %1297 = vmatpush3.msra.mxu1 %v251_v13 }
 0x252   : > { %v404_v19 = vpop.f32.mrf.mxu1 }
 0x253   : > { %v405_v20 = vadd.f32 %v404_v19, %v247_v18 }
 0x254   : > { %v1258_v21 = vpop.f32.mrf.mxu1 }
 0x255   : > { %v409_v22 = vsel %vm408_vm4, %v405_v20, -inf  ;;  %v1219_v21 = vld [vmem:[%s1849_s3] ss:$0 sm:$0xff] }
 0x256   : > { %410 = vmax.xlane.f32.xlu1 %v409_v22  ;;  %v571_v23 = vpop.f32.mrf.mxu1 }
 0x257   : > { %v572_v24 = vadd.f32 %v571_v23, %v247_v18 }
 0x258   : > { %v1268_v25 = vpop.f32.mrf.mxu1 }
 0x259   : > { %v575_v26 = vsel %vm408_vm4, %v572_v24, -inf }
 0x25a   : > { %576 = vmax.xlane.f32.xlu0 %v575_v26  ;;  %v742_v27 = vpop.f32.mrf.mxu1 }
 0x25b   : > { %v743_v28 = vadd.f32 %v742_v27, %v247_v18 }
 0x25c   : > { %v1278_v29 = vpop.f32.mrf.mxu1 }
 0x25d   : > { %v746_v30 = vsel %vm408_vm4, %v743_v28, -inf }
 0x25e   : > { %747 = vmax.xlane.f32.xlu0 %v746_v30  ;;  %v913_v31 = vpop.f32.mrf.mxu1 }
 0x25f   : > { %v914_v32 = vadd.f32 %v913_v31, %v247_v18 }
 0x260   : > { %v1288_v33 = vpop.f32.mrf.mxu1 }
 0x261   : > { %v917_v34 = vsel %vm408_vm4, %v914_v32, -inf }
 0x262   : > { %918 = vmax.xlane.f32.xlu1 %v917_v34 }
 0x273   : > { %586 = vrot.lane.b32.xlu1 %v1744_v4, %s1568_s13  ;;  %s1092_s13 = scalar_lea.sflag [#allocation5], %s1719_s30 }
 0x2df   : > { %v411_v35 = vpop.xlane.xlu1 %410 }
 0x2e0   : > { %v412_v36 = vsub.f32 %v405_v20, %v411_v35 }
 0x2e2   : > { %v413_v37 = vmul.f32 1.442695, %v412_v36 }
 0x2e3   : > { %v577_v38 = vpop.xlane.xlu0 %576 }
 0x2e4   : > { %1387 = vpow2.f32 %v413_v37  ;;  %v578_v39 = vsub.f32 %v572_v24, %v577_v38 }
 0x2e6   : > { %v579_v40 = vmul.f32 1.442695, %v578_v39 }
 0x2e7   : > { %v748_v50 = vpop.xlane.xlu0 %747 }
 0x2e8   : > { %1389 = vpow2.f32 %v579_v40  ;;  %v749_v51 = vsub.f32 %v743_v28, %v748_v50 }
 0x2ea   : > { %v750_v52 = vmul.f32 1.442695, %v749_v51 }
 0x2eb   : > { %v919_v41 = vpop.xlane.xlu1 %918 }
 0x2ec   : > { %v920_v42 = vsub.f32 %v914_v32, %v919_v41 }
 0x2ee   : > { %v921_v43 = vmul.f32 1.442695, %v920_v42 }
 0x2ef   : > { %v587_v55 = vpop.permute.xlu1 %586 }
 0x2f0   : > { %1391 = vpow2.f32 %v921_v43 }
 0x2f1   : > { %v1388_v44 = vpop.eup %1387  ;;  %1393 = vpow2.f32 %v750_v52 }
 0x2f2   : > { %v415_v45 = vsel %vm408_vm4, %v1388_v44, 0.0 }
 0x2f3   : > { %416 = vadd.xlane.f32.xlu0 %v415_v45 }
 0x2f5   : > { %v1390_v46 = vpop.eup %1389 }
 0x2f6   : > { %v581_v47 = vsel %vm408_vm4, %v1390_v46, 0.0 }
 0x2f7   : > { %582 = vadd.xlane.f32.xlu1 %v581_v47 }
 0x2fd   : > { %v1392_v48 = vpop.eup %1391 }
 0x2fe   : > { %v923_v49 = vsel %vm408_vm4, %v1392_v48, 0.0  ;;  %v1394_v53 = vpop.eup %1393 }
 0x2ff   : > { %924 = vadd.xlane.f32.xlu1 %v923_v49  ;;  %v752_v54 = vsel %vm408_vm4, %v1394_v53, 0.0 }
 0x309   : > { %420 = vrot.lane.b32.xlu0 %v1744_v4, %s1569_s25  ;;  %s1483_s25 = scalar_lea.vmem %s1106_s5, 128 }
 0x30a   : > { %p1484_p11 = scmp.ne.s32.totalorder %s1106_s5, %s1483_s25 }
 0x30c   : > { %p1485_p1 = pnand %p1484_p11, %p1866_p0 }
 0x30e   : > { %p1486_p2 = pneg %p1485_p1 }
 0x310   : > { %757 = vrot.lane.b32.xlu1 %v1744_v4, %s1570_s26  ;;  %s1489_s26 = scalar_lea.vmem %s1488_s8, 256 }
 0x311   : > { %p1491_p12 = scmp.lt.s32.totalorder %s1489_s26, %s1483_s25 }
 0x313   : > { %p1492_p7 = por %p1491_p12, %p1490_p6 }
 0x315   : > { %p1493_p9 = pnand %p1492_p7, %p1486_p2 }
 0x328   : > { %753 = vadd.xlane.f32.xlu0 %v752_v54 }
 0x33e   : > { %928 = vrot.lane.b32.xlu0 %v1744_v4, %s1571_s24 }
 0x37c   : > { %v417_v56 = vpop.xlane.xlu0 %416 }
 0x37d   : > { %1395 = vrcp.f32 %v417_v56 }
 0x380   : > { %v421_v57 = vpop.permute.xlu0 %420  ;;  %v583_v58 = vpop.xlane.xlu1 %582 }
 0x381   : > { %1397 = vrcp.f32 %v583_v58  ;;  %1260 = vmatpush3.msra.mxu0 %v421_v57 }
 0x382   : > { %1269 = vmatprep.subr.mxu0 %v1558_v0 }
 0x388   : > { %v925_v60 = vpop.xlane.xlu1 %924 }
 0x38a   : > { %v1396_v59 = vpop.eup %1395 }
 0x38b   : > { %v419_v61 = vmul.f32 %v1396_v59, %v1388_v44 }
 0x38c   : > { %v758_v1 = vpop.permute.xlu1 %757 }
 0x38d   : > { %1262 = vmatmul.mubr.msk.f32.vlgmr.msra.gmra.mxu0 %vm408_vm4, %v419_v61 }
 0x38e   : > { %v1398_v62 = vpop.eup %1397  ;;  %1270 = vmatpush3.msra.mxu0 %v587_v55  ;;  %1271 = vmatprep.mubr.msk.f32.mxu0 %vm1559_vm0, %v1558_v0 }
 0x38f   : > { %1279 = vmatprep.subr.mxu0 %v1558_v0  ;;  %v585_v63 = vmul.f32 %v1398_v62, %v1390_v46 }
 0x391   : > { %1272 = vmatmul.mubr.msk.f32.vlgmr.msra.gmra.mxu0 %vm408_vm4, %v585_v63 }
 0x392   : > { %1280 = vmatpush3.msra.mxu0 %v758_v1  ;;  %1281 = vmatprep.mubr.msk.f32.mxu0 %vm1559_vm0, %v1558_v0 }
 0x393   : > { %1289 = vmatprep.subr.mxu0 %v1558_v0 }
 0x3b1   : > { %v754_v2 = vpop.xlane.xlu0 %753 }
 0x3b2   : > { %1399 = vrcp.f32 %v754_v2 }
 0x3b3   : > { %1401 = vrcp.f32 %v925_v60 }
 0x3b5   : > { %v929_v6 = vpop.permute.xlu0 %928 }
 0x3bf   : > { %v1400_v3 = vpop.eup %1399 }
 0x3c0   : > { %v756_v4 = vmul.f32 %v1400_v3, %v1394_v53  ;;  %v1402_v5 = vpop.eup %1401 }
 0x3c1   : > { %v927_v7 = vmul.f32 %v1402_v5, %v1392_v48 }
 0x3c2   : > { %1282 = vmatmul.mubr.msk.f32.vlgmr.msra.gmra.mxu0 %vm408_vm4, %v756_v4 }
 0x3c3   : > { %1290 = vmatpush3.msra.mxu0 %v929_v6  ;;  %1291 = vmatprep.mubr.msk.f32.mxu0 %vm1559_vm0, %v1558_v0 }
 0x3c6   : > { %1292 = vmatmul.mubr.msk.f32.vlgmr.msra.gmra.mxu0 %vm408_vm4, %v927_v7 }
 0x44d   : > { %v492_v8 = vpop.f32.mrf.mxu0 }
 0x44e   : > { %496 = vst.msk [vmem:[#allocation2] sm:$0xff] %vm332_vm2, %v492_v8 }
 0x44f   : > { %v1263_v9 = vpop.f32.mrf.mxu0 }
 0x451   : > { %v658_v10 = vpop.f32.mrf.mxu0 }
 0x452   : > { %663 = vrot.lane.b32.xlu1 %v658_v10, %s1572_s27 }
 0x453   : > { %v1273_v11 = vpop.f32.mrf.mxu0 }
 0x482   : > { %v829_v14 = vpop.f32.mrf.mxu0 }
 0x483   : > { %834 = vrot.lane.b32.xlu0 %v829_v14, %s1573_s28 }
 0x484   : > { %v1283_v15 = vpop.f32.mrf.mxu0 }
 0x486   : > { %v1000_v16 = vpop.f32.mrf.mxu0 }
 0x487   : > { %1005 = vrot.lane.b32.xlu1 %v1000_v16, %s1574_s9 }
 0x488   : > { %v1293_v17 = vpop.f32.mrf.mxu0 }
 0x4c4   : > { %v664_v18 = vpop.permute.xlu1 %663 }
 0x4c5   : > { %667 = vst.msk [vmem:[#allocation2] sm:$0xff] %vm666_vm5, %v664_v18 }
 0x4f5   : > { %v835_v19 = vpop.permute.xlu0 %834 }
 0x4f6   : > { %838 = vst.msk [vmem:[#allocation2] sm:$0xff] %vm837_vm6, %v835_v19 }
 0x4f9   : > { %v1006_v0 = vpop.permute.xlu1 %1005 }
 0x4fa   : > { %1009 = vst.msk [vmem:[#allocation2] sm:$0xff] %vm1008_vm7, %v1006_v0 }
 0x501   : > { %v1010_v20 = vld [vmem:[#allocation2] sm:$0xff] }
 0x502   : > { %1299 = vmatmul.mubr.msk.f32.vlgmr.msra.gmra.mxu1 %vm254_vm1, %v1010_v20 }
 0x5c2   : > { %v1086_v22 = vpop.f32.mrf.mxu1 }
 0x5c3   : > { %v1087_v23 = vadd.f32 %v1219_v21, %v1086_v22 }
 0x5c4   : > { %v1300_v24 = vpop.f32.mrf.mxu1 }
 0x5c5   : > { %1090 = vst.msk [vmem:[%s241_s29] sm:$0xff] %vm254_vm1, %v1087_v23 }
 0x5c6   : > { %1496 = shalt.err (!%p1493_p9)
}
 0x5c7   : > { %s1497_s24 = scalar_lea.hbm %s1808_s12, 128  ;;  %s1501_s28 = scalar_lea.hbm %s1850_s4, 256 }
 0x5c8   : > { %p1498_p13 = scmp.ne.s32.totalorder %s1808_s12, %s1497_s24  ;;  %p1502_p4 = scmp.lt.s32.totalorder %s1808_s12, %s1850_s4 }
 0x5c9   : > { %p1503_p8 = scmp.lt.s32.totalorder %s1501_s28, %s1497_s24 }
 0x5ca   : > { %p1499_p5 = pnand %p1498_p13, %p1866_p0 }
 0x5cb   : > { %p1504_p3 = por %p1503_p8, %p1502_p4 }
 0x5cc   : > { %p1500_p10 = pneg %p1499_p5 }
 0x5ce   : > { %p1505_p11 = pnand %p1504_p3, %p1500_p10 }
 0x5d0   : > { %1508 = shalt.err (!%p1505_p11)
}
 0x5d1   : > { %1311 = dma.vmem_to_hbm [thread:$0]  (%p1866_p0), %s1106_s5, 128, %s1808_s12, %s1092_s13  }
 0x5d2 PF: > { %s1117_s21 = sand.u32 1, %s1539_s15   ;;  %p1867_p1 = scmp.ne.s32.totalorder %s1856_s22, 0 }
 0x5d3   : > { %p1868_p2 = scmp.ge.s32.totalorder %s1551_s18, 2  ;;  %s1118_s23 = scalar_lea.sflag [#allocation5], %s1117_s21 }
 0x5d5   : > { %p1325_p6 = pnand %p1868_p2, %p1867_p1 }
 0x5d7   : > { %p1326_p12 = pneg %p1325_p6 }
 0x5d9   : > { %1534 = dma.done.wait (%p1326_p12), %s1118_s23, 128  }
 0x5da   : > { %1536 = vsyncadd (%p1326_p12), %s1118_s23, 4294967168  ;;  %p18_p7 = scmp.ge.s32.totalorder %s1673_s11, 4   ;;  %s1869_s15 = smov %s1543_s16 }
 0x5db   : > { %s1870_s16 = smov %s1547_s17  ;;  %s1871_s17 = smov %s1689_s20 }
 0x5dc   : > { %s1872_s18 = smov %s1673_s11  ;;  %20 = sbr.rel (!%p18_p7) target bundleno = 6 (0x6), region = 89 }
 0x5e1   :  { %1123 = vsyncpa [#allocation4], 1 }
 0x5e2   :  { %1125 = vsyncpa [#allocation4 + $0x1], 1 }
 0x5e3   :  { %1126 = vsyncpa [#allocation7], 1 }
 0x5e4   :  { %1127 = vsyncpa [#allocation5], 1 }
 0x5e5   :  { %1129 = vsyncpa [#allocation5 + $0x1], 1 }

</bundles_post_ra>
